<compile_context>
chip_gen: v7x
topology: tpu7x:2x2x1
jax: 0.10.0
libtpu: 0.0.40
codegen_flags: <defaults>
</compile_context>

<pallas_src>
import jax
import jax.numpy as jnp
import numpy as np
from jax.experimental import pallas as pl
from jax.experimental.pallas import tpu as pltpu

EMBEDDING_SIZE = 128          # original module: 500 (shrunk; shapes stay parametric)
NUM_FILTERS = 10
WINDOW_SIZES = (1, 2, 3, 5)
LANE = 128
SUBLANE = 8


def _round_up(x, m):
    return ((x + m - 1) // m) * m


# ------------------------------ Pallas kernel ------------------------------ #

def _fused_cnn_kernel(emb_ref, w_ref, b_ref, mask_ref, fcw_ref, fcb_ref,
                      out_ref, act_ref):
    # emb_ref : (Bt, L_pad, E)        padded-once embeddings for this batch tile
    # w_ref   : (n_taps*E, N)         im2col-packed conv weights, all windows on lanes
    # b_ref   : (1, N)                packed conv biases
    # mask_ref: (T, N) f32            additive validity mask (0 valid / -4 invalid)
    # fcw_ref : (N, C_pad)            FC weight (rows permuted to packed feature order)
    # fcb_ref : (1, C_pad)            FC bias (-1e30 on padded classes)
    # out_ref : (Bt, C_pad)           softmax probabilities (padded classes ~ 0)
    # act_ref : (Bt, T, N) VMEM       scratch bounding the activation's live range
    bt, _, e = emb_ref.shape
    t_len, n = mask_ref.shape
    n_taps = w_ref.shape[0] // e

    # im2col: concat the n_taps shifted views along E -> ONE K = n_taps*E matmul.
    xs = jnp.concatenate([emb_ref[:, r:r + t_len, :] for r in range(n_taps)],
                         axis=-1).reshape(bt * t_len, n_taps * e)
    acc = jnp.dot(xs, w_ref[...], preferred_element_type=jnp.float32)

    # tanh + bias, then the additive per-window validity mask (tanh > -1, so a
    # -4 offset never wins the max), then full-length max-pool over time.
    act_ref[...] = (jnp.tanh(acc.reshape(bt, t_len, n) + b_ref[...])
                    + mask_ref[...])
    pooled = jnp.max(act_ref[...], axis=1)                  # (Bt, N)

    # Linear + softmax, all resident; padded classes carry -1e30 bias -> exp=0.
    logits = jnp.dot(pooled, fcw_ref[...],
                     preferred_element_type=jnp.float32) + fcb_ref[...]
    m = jnp.max(logits, axis=-1, keepdims=True)
    ex = jnp.exp(logits - m)
    out_ref[...] = ex * pl.reciprocal(jnp.sum(ex, axis=-1, keepdims=True),
                                      approx=True)


# ------------------------------ Param packing ------------------------------ #

def pack_params(params, window_sizes, num_filters, num_classes):
    """Rearrange torch-layout params into the lane-dense packed kernel layout."""
    vocab, e = params["embedding"].shape
    nw = len(window_sizes)
    max_win = max(window_sizes)
    pad_max = max_win - 1
    n_real = nw * num_filters
    n_pad = _round_up(max(n_real, LANE), LANE)          # lane-dense feature width
    e_pad = _round_up(e, LANE)                          # E=500 -> 512 etc.
    c_pad = _round_up(max(num_classes, LANE), LANE)     # lane-dense class width

    emb_tbl = jnp.pad(params["embedding"], ((0, 0), (0, e_pad - e)))

    w = np.zeros((max_win, e_pad, n_pad), np.float32)
    b = np.zeros((1, n_pad), np.float32)
    tmin = np.zeros((n_pad,), np.int32)
    for wi, win in enumerate(window_sizes):
        col = wi * num_filters
        w[:win, :e, col:col + num_filters] = np.asarray(params[f"conv{win}_w"])
        b[:, col:col + num_filters] = np.asarray(params[f"conv{win}_b"])
        # window w is valid for unified time index t' in [pad_max-w+1, pad_max+L-1]
        tmin[col:col + num_filters] = pad_max - win + 1

    # torch flatten is filter-major / window-minor (index f*NW + wi);
    # kernel features are window-major (wi*F + f) -> permute FC weight rows.
    fc_w = np.asarray(params["fc_w"])                    # (C, F*NW)
    fc_perm = np.transpose(fc_w.reshape(num_classes, num_filters, nw), (2, 1, 0))
    fc_w_t = np.zeros((n_pad, c_pad), np.float32)
    fc_w_t[:n_real, :num_classes] = fc_perm.reshape(n_real, num_classes)
    fc_b = np.full((1, c_pad), -1e30, np.float32)        # padded classes -> prob 0
    fc_b[:, :num_classes] = np.asarray(params["fc_b"])

    return dict(embedding=emb_tbl,
                w2d=jnp.asarray(w.reshape(max_win * e_pad, n_pad)),
                b=jnp.asarray(b),
                tmin=tmin,                               # host-side; mask built per L
                fc_w_t=jnp.asarray(fc_w_t),
                fc_b=jnp.asarray(fc_b),
                n_taps=max_win,
                num_classes=num_classes)


# ------------------------------ Tile sizing --------------------------------- #

def _per_row_vmem_bytes(l_pad, t_len, e, n_taps, n_pad):
    # per batch-row of a tile: double-buffered input block + im2col slab +
    # f32 conv accumulator + activation scratch (all f32 = 4 B).
    return 4 * (2 * l_pad * e + t_len * n_taps * e + 2 * t_len * n_pad)


def _pick_b_tile(batch, l_pad, t_len, e, n_taps, n_pad):
    """Largest batch tile (multiple of 8, <= 256) whose working set fits VMEM.

    Budget is conservative for v7x's 64 MiB physical VMEM (v5e/v6e have
    128 MiB, so the same tile is safe there).  Keeps >= 2 grid steps when the
    batch allows it so ("parallel",) can shard across v7x's two TensorCores.
    """
    budget = 40 << 20
    per_row = _per_row_vmem_bytes(l_pad, t_len, e, n_taps, n_pad)
    cap = max(SUBLANE, min(256, (budget // per_row) // SUBLANE * SUBLANE))
    if batch <= SUBLANE:
        return SUBLANE                       # tiny batch: one minimal tile
    two_steps = _round_up((batch + 1) // 2, SUBLANE)
    return int(min(cap, two_steps))


# ------------------------------ Forward pass ------------------------------- #

def cnn_text_classifier_forward(tokens, packed):
    # Embedding lookup is gather "glue" -- kept in plain JAX (see TODO at top
    # about moving it in-kernel to halve HBM traffic on the largest operand).
    emb = jnp.take(packed["embedding"], tokens, axis=0)   # (B, L, E_pad)
    B, L, E = emb.shape

    n_taps = packed["n_taps"]                             # == max window size
    pad_max = n_taps - 1
    t_valid = L + pad_max                                 # union of all valid t'
    t_len = _round_up(t_valid, SUBLANE)                   # aligned time extent
    l_pad = _round_up(t_len + n_taps - 1, SUBLANE)        # aligned padded length

    n_pad = packed["b"].shape[1]
    c_pad = packed["fc_w_t"].shape[1]

    b_tile = _pick_b_tile(B, l_pad, t_len, E, n_taps, n_pad)
    b_pad = _round_up(B, b_tile)

    # Pad ONCE (left = max window padding; right zeros are masked out).
    emb_p = jnp.pad(emb, ((0, b_pad - B),
                          (pad_max, l_pad - L - pad_max),
                          (0, 0)))

    # Precomputed additive validity mask: 0 where this column's window has a
    # valid output at unified time t, -4 elsewhere (tanh > -1 so -4 never wins).
    t_idx = np.arange(t_len, dtype=np.int32)[:, None]
    mask = jnp.asarray(
        np.where((t_idx >= packed["tmin"][None, :]) & (t_idx < t_valid),
                 0.0, -4.0).astype(np.float32))

    # Only raise the scoped-VMEM limit when the working set actually needs it
    # (the default is 16/32 MiB depending on generation).
    weight_bytes = 2 * 4 * (n_taps * E * n_pad + n_pad * c_pad + 2 * n_pad + 2 * c_pad)
    vmem_need = _per_row_vmem_bytes(l_pad, t_len, E, n_taps, n_pad) * b_tile + weight_bytes
    cparams = dict(dimension_semantics=("parallel",))
    if vmem_need > (24 << 20):
        cparams["vmem_limit_bytes"] = int(min(56 << 20,
                                              _round_up(vmem_need + (4 << 20), 1 << 20)))

    out = pl.pallas_call(
        _fused_cnn_kernel,
        out_shape=jax.ShapeDtypeStruct((b_pad, c_pad), jnp.float32),
        grid=(b_pad // b_tile,),
        in_specs=[
            pl.BlockSpec((b_tile, l_pad, E), lambda i: (i, 0, 0)),
            pl.BlockSpec((n_taps * E, n_pad), lambda i: (0, 0)),
            pl.BlockSpec((1, n_pad), lambda i: (0, 0)),
            pl.BlockSpec((t_len, n_pad), lambda i: (0, 0)),
            pl.BlockSpec((n_pad, c_pad), lambda i: (0, 0)),
            pl.BlockSpec((1, c_pad), lambda i: (0, 0)),
        ],
        out_specs=pl.BlockSpec((b_tile, c_pad), lambda i: (i, 0)),
        scratch_shapes=[pltpu.VMEM((b_tile, t_len, n_pad), jnp.float32)],
        compiler_params=pltpu.CompilerParams(**cparams),
    )(emb_p, packed["w2d"], packed["b"], mask,
      packed["fc_w_t"], packed["fc_b"])
    return out[:B, :packed["num_classes"]]


# ------------------------------- Reference --------------------------------- #

def reference_forward(tokens, params):
    emb = jnp.take(params["embedding"], tokens, axis=0)
    pooled = []
    for win in WINDOW_SIZES:
        pad = win - 1
        emb_p = jnp.pad(emb, ((0, 0), (pad, pad), (0, 0)))
        l_out = emb_p.shape[1] - win + 1
        w = params[f"conv{win}_w"]
        acc = 0.0
        for r in range(win):
            acc = acc + jnp.einsum("ble,ef->blf", emb_p[:, r:r + l_out, :], w[r])
        act = jnp.tanh(acc + params[f"conv{win}_b"])
        pooled.append(jnp.max(act, axis=1))
    feat = jnp.stack(pooled, axis=-1).reshape(tokens.shape[0], -1)  # filter-major
    logits = feat @ params["fc_w"].T + params["fc_b"]
    return jax.nn.softmax(logits, axis=-1)


# ---------------------------------- Main ----------------------------------- #

if __name__ == "__main__":
    B, L = 2, 8
    VOCAB = 50
    NUM_CLASSES = 5

    key = jax.random.PRNGKey(0)
    k_iter = iter(jax.random.split(key, 16))

    params = {}
    params["embedding"] = 0.1 * jax.random.normal(
        next(k_iter), (VOCAB, EMBEDDING_SIZE), jnp.float32)
    for win in WINDOW_SIZES:
        # PyTorch Conv2d weight shape: (F, 1, win, E) -> rearranged to (win, E, F)
        w_torch = 0.05 * jax.random.normal(
            next(k_iter), (NUM_FILTERS, 1, win, EMBEDDING_SIZE), jnp.float32)
        params[f"conv{win}_w"] = jnp.transpose(w_torch[:, 0], (1, 2, 0))
        params[f"conv{win}_b"] = 0.05 * jax.random.normal(
            next(k_iter), (1, NUM_FILTERS), jnp.float32)
    # PyTorch Linear weight is (C, F*NW).
    params["fc_w"] = 0.1 * jax.random.normal(
        next(k_iter), (NUM_CLASSES, NUM_FILTERS * len(WINDOW_SIZES)), jnp.float32)
    params["fc_b"] = 0.1 * jax.random.normal(
        next(k_iter), (1, NUM_CLASSES), jnp.float32)

    tokens = jax.random.randint(next(k_iter), (B, L), 0, VOCAB, dtype=jnp.int32)

    packed = pack_params(params, WINDOW_SIZES, NUM_FILTERS, NUM_CLASSES)

    probs = jax.block_until_ready(cnn_text_classifier_forward(tokens, packed))
    ref = jax.block_until_ready(reference_forward(tokens, params))

    assert probs.shape == (B, NUM_CLASSES)
    np.testing.assert_allclose(np.asarray(probs), np.asarray(ref),
                               atol=1e-3, rtol=1e-3)
    print("KERNEL_OK")
</pallas_src>

<mosaic_0001>
module attributes {stable_mosaic.version = 11 : i64} {
  func.func @_fused_cnn_kernel(%arg0: i32, %arg1: memref<8x24x128xf32, #tpu.memory_space<vmem>>, %arg2: memref<640x128xf32, #tpu.memory_space<vmem>>, %arg3: memref<1x128xf32, #tpu.memory_space<vmem>>, %arg4: memref<16x128xf32, #tpu.memory_space<vmem>>, %arg5: memref<128x128xf32, #tpu.memory_space<vmem>>, %arg6: memref<1x128xf32, #tpu.memory_space<vmem>>, %arg7: memref<8x128xf32, #tpu.memory_space<vmem>>, %arg8: memref<8x16x128xf32, #tpu.memory_space<vmem>>) attributes {dimension_semantics = [#tpu.dimension_semantics<parallel>], iteration_bounds = array<i64: 1>, scalar_prefetch = 0 : i64, scratch_operands = 1 : i64, tpu.core_type = #tpu.core_type<tc>, window_params = [{transform_indices = @transform_0, window_bounds = array<i64: 8, 24, 128>}, {pipeline_mode = #tpu.pipeline_mode<synchronous>, transform_indices = @transform_1, window_bounds = array<i64: 640, 128>}, {pipeline_mode = #tpu.pipeline_mode<synchronous>, transform_indices = @transform_2, window_bounds = array<i64: 1, 128>}, {pipeline_mode = #tpu.pipeline_mode<synchronous>, transform_indices = @transform_3, window_bounds = array<i64: 16, 128>}, {pipeline_mode = #tpu.pipeline_mode<synchronous>, transform_indices = @transform_4, window_bounds = array<i64: 128, 128>}, {pipeline_mode = #tpu.pipeline_mode<synchronous>, transform_indices = @transform_5, window_bounds = array<i64: 1, 128>}, {transform_indices = @transform_6, window_bounds = array<i64: 8, 128>}]} {
    %c0 = arith.constant 0 : index
    %c0_0 = arith.constant 0 : index
    %c0_1 = arith.constant 0 : index
    %0 = vector.load %arg1[%c0, %c0_0, %c0_1] : memref<8x24x128xf32, #tpu.memory_space<vmem>>, vector<8x16x128xf32>
    %c0_2 = arith.constant 0 : index
    %c1 = arith.constant 1 : index
    %c0_3 = arith.constant 0 : index
    %1 = vector.load %arg1[%c0_2, %c1, %c0_3] : memref<8x24x128xf32, #tpu.memory_space<vmem>>, vector<8x16x128xf32>
    %c0_4 = arith.constant 0 : index
    %c2 = arith.constant 2 : index
    %c0_5 = arith.constant 0 : index
    %2 = vector.load %arg1[%c0_4, %c2, %c0_5] : memref<8x24x128xf32, #tpu.memory_space<vmem>>, vector<8x16x128xf32>
    %c0_6 = arith.constant 0 : index
    %c3 = arith.constant 3 : index
    %c0_7 = arith.constant 0 : index
    %3 = vector.load %arg1[%c0_6, %c3, %c0_7] : memref<8x24x128xf32, #tpu.memory_space<vmem>>, vector<8x16x128xf32>
    %c0_8 = arith.constant 0 : index
    %c4 = arith.constant 4 : index
    %c0_9 = arith.constant 0 : index
    %4 = vector.load %arg1[%c0_8, %c4, %c0_9] : memref<8x24x128xf32, #tpu.memory_space<vmem>>, vector<8x16x128xf32>
    %5 = tpu.concatenate %0, %1, %2, %3, %4 in 2 : vector<8x16x128xf32>, vector<8x16x128xf32>, vector<8x16x128xf32>, vector<8x16x128xf32>, vector<8x16x128xf32> -> vector<8x16x640xf32>
    %6 = vector.shape_cast %5 : vector<8x16x640xf32> to vector<128x640xf32>
    %c0_10 = arith.constant 0 : index
    %c0_11 = arith.constant 0 : index
    %7 = vector.load %arg2[%c0_10, %c0_11] : memref<640x128xf32, #tpu.memory_space<vmem>>, vector<640x128xf32>
    %cst = arith.constant dense<0.000000e+00> : vector<128x128xf32>
    %8 = tpu.matmul %6, %7, %cst {dimension_numbers = #tpu.dot_dimension_numbers<[1], [0], [0], [1], [0, 0, 1, 1], [], []>} : vector<128x640xf32>, vector<640x128xf32>, vector<128x128xf32> -> vector<128x128xf32>
    %9 = vector.shape_cast %8 : vector<128x128xf32> to vector<8x16x128xf32>
    %c0_12 = arith.constant 0 : index
    %c0_13 = arith.constant 0 : index
    %10 = vector.load %arg3[%c0_12, %c0_13] : memref<1x128xf32, #tpu.memory_space<vmem>>, vector<1x128xf32>
    %11 = vector.shape_cast %10 : vector<1x128xf32> to vector<1x1x128xf32>
    %12 = vector.broadcast %11 : vector<1x1x128xf32> to vector<8x16x128xf32>
    %13 = arith.addf %9, %12 : vector<8x16x128xf32>
    %14 = math.tanh %13 : vector<8x16x128xf32>
    %c0_14 = arith.constant 0 : index
    %c0_15 = arith.constant 0 : index
    %15 = vector.load %arg4[%c0_14, %c0_15] : memref<16x128xf32, #tpu.memory_space<vmem>>, vector<16x128xf32>
    %16 = vector.shape_cast %15 : vector<16x128xf32> to vector<1x16x128xf32>
    %17 = vector.broadcast %16 : vector<1x16x128xf32> to vector<8x16x128xf32>
    %18 = arith.addf %14, %17 : vector<8x16x128xf32>
    %c0_16 = arith.constant 0 : index
    %c0_17 = arith.constant 0 : index
    %c0_18 = arith.constant 0 : index
    %19 = vector.load %arg8[%c0_16, %c0_17, %c0_18] : memref<8x16x128xf32, #tpu.memory_space<vmem>>, vector<8x16x128xf32>
    tpu.vector_store %arg8[%c0_16, %c0_17, %c0_18], %18 {strides = array<i32>} : memref<8x16x128xf32, #tpu.memory_space<vmem>>, vector<8x16x128xf32>,
    %c0_19 = arith.constant 0 : index
    %c0_20 = arith.constant 0 : index
    %c0_21 = arith.constant 0 : index
    %20 = vector.load %arg8[%c0_19, %c0_20, %c0_21] : memref<8x16x128xf32, #tpu.memory_space<vmem>>, vector<8x16x128xf32>
    %cst_22 = arith.constant dense<0xFF800000> : vector<8x128xf32>
    %21 = vector.multi_reduction <maximumf>, %20, %cst_22 [1] : vector<8x16x128xf32> to vector<8x128xf32>
    %c0_23 = arith.constant 0 : index
    %c0_24 = arith.constant 0 : index
    %22 = vector.load %arg5[%c0_23, %c0_24] : memref<128x128xf32, #tpu.memory_space<vmem>>, vector<128x128xf32>
    %cst_25 = arith.constant dense<0.000000e+00> : vector<8x128xf32>
    %23 = tpu.matmul %21, %22, %cst_25 {dimension_numbers = #tpu.dot_dimension_numbers<[1], [0], [0], [1], [0, 0, 1, 1], [], []>} : vector<8x128xf32>, vector<128x128xf32>, vector<8x128xf32> -> vector<8x128xf32>
    %c0_26 = arith.constant 0 : index
    %c0_27 = arith.constant 0 : index
    %24 = vector.load %arg6[%c0_26, %c0_27] : memref<1x128xf32, #tpu.memory_space<vmem>>, vector<1x128xf32>
    %25 = vector.broadcast %24 : vector<1x128xf32> to vector<8x128xf32>
    %26 = arith.addf %23, %25 : vector<8x128xf32>
    %cst_28 = arith.constant dense<0xFF800000> : vector<8xf32>
    %27 = vector.multi_reduction <maximumf>, %26, %cst_28 [1] : vector<8x128xf32> to vector<8xf32>
    %28 = vector.shape_cast %27 : vector<8xf32> to vector<8x1xf32>
    %29 = vector.broadcast %28 : vector<8x1xf32> to vector<8x128xf32>
    %30 = arith.subf %26, %29 : vector<8x128xf32>
    %31 = math.exp %30 : vector<8x128xf32>
    %cst_29 = arith.constant dense<0.000000e+00> : vector<8xf32>
    %32 = vector.multi_reduction <add>, %31, %cst_29 [1] : vector<8x128xf32> to vector<8xf32>
    %33 = vector.shape_cast %32 : vector<8xf32> to vector<8x1xf32>
    %34 = tpu.reciprocal %33 {approx = true} : vector<8x1xf32> -> vector<8x1xf32>
    %35 = vector.broadcast %34 : vector<8x1xf32> to vector<8x128xf32>
    %36 = arith.mulf %31, %35 : vector<8x128xf32>
    %c0_30 = arith.constant 0 : index
    %c0_31 = arith.constant 0 : index
    %37 = vector.load %arg7[%c0_30, %c0_31] : memref<8x128xf32, #tpu.memory_space<vmem>>, vector<8x128xf32>
    tpu.vector_store %arg7[%c0_30, %c0_31], %36 {strides = array<i32>} : memref<8x128xf32, #tpu.memory_space<vmem>>, vector<8x128xf32>,
    return
  }
  func.func @transform_0(%arg0: i32) -> (i32, i32, i32) {
    %c0_i32 = arith.constant 0 : i32
    %c0_i32_0 = arith.constant 0 : i32
    %c0_i32_1 = arith.constant 0 : i32
    return %arg0, %c0_i32, %c0_i32_0 : i32, i32, i32
  }
  func.func @transform_1(%arg0: i32) -> (i32, i32) {
    %c0_i32 = arith.constant 0 : i32
    %c0_i32_0 = arith.constant 0 : i32
    %c0_i32_1 = arith.constant 0 : i32
    return %c0_i32, %c0_i32_0 : i32, i32
  }
  func.func @transform_2(%arg0: i32) -> (i32, i32) {
    %c0_i32 = arith.constant 0 : i32
    %c0_i32_0 = arith.constant 0 : i32
    %c0_i32_1 = arith.constant 0 : i32
    return %c0_i32, %c0_i32_0 : i32, i32
  }
  func.func @transform_3(%arg0: i32) -> (i32, i32) {
    %c0_i32 = arith.constant 0 : i32
    %c0_i32_0 = arith.constant 0 : i32
    %c0_i32_1 = arith.constant 0 : i32
    return %c0_i32, %c0_i32_0 : i32, i32
  }
  func.func @transform_4(%arg0: i32) -> (i32, i32) {
    %c0_i32 = arith.constant 0 : i32
    %c0_i32_0 = arith.constant 0 : i32
    %c0_i32_1 = arith.constant 0 : i32
    return %c0_i32, %c0_i32_0 : i32, i32
  }
  func.func @transform_5(%arg0: i32) -> (i32, i32) {
    %c0_i32 = arith.constant 0 : i32
    %c0_i32_0 = arith.constant 0 : i32
    %c0_i32_1 = arith.constant 0 : i32
    return %c0_i32, %c0_i32_0 : i32, i32
  }
  func.func @transform_6(%arg0: i32) -> (i32, i32) {
    %c0_i32 = arith.constant 0 : i32
    %c0_i32_0 = arith.constant 0 : i32
    return %arg0, %c0_i32 : i32, i32
  }
}

</mosaic_0001>

<bundles_post_ra>
// kernel: tpu_custom_call.1
= control target key start
LH: loop header
LB: loop body
LE: loop exit
PB: predicated region body
PF: predicated region fallthrough
CT: control target
= control target key end

     0   :  { %11 = vsyncpa [#allocation4], 0  ;;  %s1771_s0 = inlined_call_operand.hbm [shape: f32[8,24,128], index: 0, kind: input, shape index: {}]   ;;  %s1772_s1 = inlined_call_operand.hbm [shape: f32[640,128], index: 1, kind: input, shape index: {}]   ;;  %s1773_s2 = inlined_call_operand.vmem [shape: f32[1,128], index: 2, kind: input, shape index: {}]   ;;  %s1774_s3 = inlined_call_operand.hbm [shape: f32[16,128], index: 3, kind: input, shape index: {}]   ;;  %s1775_s4 = inlined_call_operand.hbm [shape: f32[128,128], index: 4, kind: input, shape index: {}]   ;;  %s1776_s5 = inlined_call_operand.vmem [shape: f32[1,128], index: 5, kind: input, shape index: {}]   ;;  %s1777_s6 = inlined_call_operand.hbm [shape: f32[8,128], index: 6, kind: output, shape index: {}]  }
   0x1   :  { %12 = vsyncpa [#allocation7], 0 }
   0x2   :  { %13 = vsyncpa [#allocation10], 0 }
   0x3   :  { %14 = vsyncpa [#allocation5], 0  ;;  %s1548_s21 = smov [#allocation6]   ;;  %s1549_s23 = smov [#allocation3]  }
   0x4   :  { %s32_s22 = sshll.u32 %s1548_s21, 4  ;;  %s20_s24 = sshll.u32 %s1549_s23, 4  ;;  %s33_s22 = int_to_ptr.vmem [resolvable:$true] %s32_s22  ;;  %s1593_s24 = int_to_ptr.vmem [resolvable:$true] %s20_s24 }
   0x5   :  { %s1430_s27 = scalar_lea.hbm %s1772_s1, 10240 }
   0x6   :  { %p1431_p0 = scmp.ne.s32.totalorder %s1772_s1, %s1430_s27  ;;  %p1434_p1 = scmp.lt.u32.totalorder %s1430_s27, %s1772_s1 }
   0x8   :  { %p1436_p2 = pnand %p1434_p1, %p1431_p0 }
   0xa   :  { %1439 = shalt.err (!%p1436_p2)
}
   0xb   :  { %s1440_s8 = scalar_lea.vmem %s33_s22, 10240  ;;  %p1445_p4 = scmp.lt.s32.totalorder %s33_s22, %s33_s22 }
   0xc   :  { %p1441_p3 = scmp.ne.s32.totalorder %s33_s22, %s1440_s8  ;;  %p1446_p5 = scmp.lt.s32.totalorder %s1440_s8, %s1440_s8 }
   0xe   :  { %p1447_p6 = por %p1446_p5, %p1445_p4 }
  0x10   :  { %p1448_p7 = pnand %p1447_p6, %p1441_p3 }
  0x12   :  { %1451 = shalt.err (!%p1448_p7)
}
  0x13   :  { %s1550_s9 = smov 128   ;;  %s1551_s10 = smov 8  }
  0x14   :  { %38 = dma.hbm_to_vmem [thread:$0]  %s1772_s1, 10240, %s33_s22, [#allocation7], %s1550_s9, %s1550_s9, %s1551_s10  }
  0x15   :  { %s1452_s15 = scalar_lea.hbm %s1771_s0, 3072 }
  0x16   :  { %p1453_p8 = scmp.ne.s32.totalorder %s1771_s0, %s1452_s15  ;;  %p1456_p9 = scmp.lt.u32.totalorder %s1452_s15, %s1771_s0 }
  0x18   :  { %p1458_p10 = pnand %p1456_p9, %p1453_p8 }
  0x1a   :  { %1461 = shalt.err (!%p1458_p10)
}
  0x1b   :  { %s1462_s20 = scalar_lea.vmem %s1593_s24, 3072  ;;  %p1467_p12 = scmp.lt.s32.totalorder %s1593_s24, %s1593_s24 }
  0x1c   :  { %p1463_p11 = scmp.ne.s32.totalorder %s1593_s24, %s1462_s20  ;;  %p1468_p13 = scmp.lt.s32.totalorder %s1462_s20, %s1462_s20 }
  0x1e   :  { %p1469_p0 = por %p1468_p13, %p1467_p12 }
  0x20   :  { %p1470_p1 = pnand %p1469_p0, %p1463_p11 }
  0x22   :  { %1473 = shalt.err (!%p1470_p1)
}
  0x23   :  { %26 = dma.hbm_to_vmem [thread:$0]  %s1771_s0, 3072, %s1593_s24, [#allocation4], %s1550_s9, %s1550_s9, %s1551_s10  }
  0x24   :  { %s1552_s22 = smov [#allocation8]   ;;  %s1553_s25 = smov [#allocation9]  }
  0x25   :  { %s46_s23 = sshll.u32 %s1552_s22, 4  ;;  %s58_s26 = sshll.u32 %s1553_s25, 4  ;;  %s47_s23 = int_to_ptr.vmem [resolvable:$true] %s46_s23  ;;  %s1630_s26 = int_to_ptr.vmem [resolvable:$true] %s58_s26 }
  0x26   :  { %s1474_s29 = scalar_lea.hbm %s1774_s3, 256 }
  0x27   :  { %p1475_p2 = scmp.ne.s32.totalorder %s1774_s3, %s1474_s29  ;;  %p1478_p3 = scmp.lt.u32.totalorder %s1474_s29, %s1774_s3 }
  0x29   :  { %p1480_p4 = pnand %p1478_p3, %p1475_p2 }
  0x2b   :  { %1483 = shalt.err (!%p1480_p4)
}
  0x2c   :  { %s1484_s0 = scalar_lea.vmem %s47_s23, 256  ;;  %p1489_p6 = scmp.lt.s32.totalorder %s47_s23, %s47_s23 }
  0x2d   :  { %p1485_p5 = scmp.ne.s32.totalorder %s47_s23, %s1484_s0  ;;  %p1490_p7 = scmp.lt.s32.totalorder %s1484_s0, %s1484_s0 }
  0x2f   :  { %p1491_p8 = por %p1490_p7, %p1489_p6 }
  0x31   :  { %p1492_p9 = pnand %p1491_p8, %p1485_p5 }
  0x33   :  { %1495 = shalt.err (!%p1492_p9)
}
  0x34   :  { %52 = dma.hbm_to_vmem [thread:$0]  %s1774_s3, 256, %s47_s23, [#allocation7], %s1550_s9, %s1550_s9, %s1551_s10  }
  0x35   :  { %s1496_s15 = scalar_lea.hbm %s1775_s4, 2048 }
  0x36   :  { %p1497_p10 = scmp.ne.s32.totalorder %s1775_s4, %s1496_s15  ;;  %p1500_p11 = scmp.lt.u32.totalorder %s1496_s15, %s1775_s4 }
  0x38   :  { %p1502_p12 = pnand %p1500_p11, %p1497_p10 }
  0x3a   :  { %1505 = shalt.err (!%p1502_p12)
}
  0x3b   :  { %s1506_s20 = scalar_lea.vmem %s1630_s26, 2048  ;;  %p1511_p0 = scmp.lt.s32.totalorder %s1630_s26, %s1630_s26 }
  0x3c   :  { %p1507_p13 = scmp.ne.s32.totalorder %s1630_s26, %s1506_s20  ;;  %p1512_p1 = scmp.lt.s32.totalorder %s1506_s20, %s1506_s20 }
  0x3e   :  { %p1513_p2 = por %p1512_p1, %p1511_p0 }
  0x40   :  { %p1514_p3 = pnand %p1513_p2, %p1507_p13 }
  0x42   :  { %1517 = shalt.err (!%p1514_p3)
}
  0x43   :  { %64 = dma.hbm_to_vmem [thread:$0]  %s1775_s4, 2048, %s1630_s26, [#allocation10], %s1550_s9, %s1550_s9, %s1551_s10  }
  0x44   :  { %1540 = dma.done.wait [#allocation4], 3072  }
  0x45   :  { %1541 = vsyncadd [#allocation4], 4294964224 }
  0x46   :  { %1542 = dma.done.wait [#allocation7], 10496  }
  0x47   :  { %1543 = vsyncadd [#allocation7], 4294956800 }
  0x48   :  { %1544 = dma.done.wait [#allocation10], 2048  }
  0x49   :  { %1545 = vsyncadd [#allocation10], 4294965248  ;;  %v175_v0 = vld [vmem:[#allocation6 + $0x80] sm:$0xff]  ;;  %v176_v1 = vld [vmem:[#allocation6 + $0x88] sm:$0xff]  ;;  %vm1555_vm0 = vmmov 0   ;;  %vm850_vm1 = vcmask 1041409  }
  0x4a   :  { %v207_v2 = vld [vmem:[#allocation6 + $0x180] sm:$0xff]  ;;  %v1264_v3 = vpack.c.bf16 %v176_v1, %v175_v0  ;;  %v208_v4 = vld [vmem:[#allocation6 + $0x188] sm:$0xff]  ;;  %v177_v11 = vld [vmem:[#allocation6 + $0x90] sm:$0xff]  ;;  %vm852_vm2 = vcmask 1042434   ;;  %vm854_vm3 = vcmask 1043459   ;;  %vm856_vm4 = vcmask 1044484  }
  0x4b   :  { %v159_v5 = vld [vmem:[#allocation6] sm:$0xff]  ;;  %v160_v6 = vld [vmem:[#allocation6 + $0x8] sm:$0xff]  ;;  %v1296_v7 = vpack.c.bf16 %v208_v4, %v207_v2  ;;  %v178_v13 = vld [vmem:[#allocation6 + $0x98] sm:$0xff]  ;;  %vm858_vm5 = vcmask 1045509   ;;  %vm860_vm6 = vcmask 1046534   ;;  %vm862_vm7 = vcmask 1047559  }
  0x4c   :  { %v1266_v8 = vpack.c.bf16 %v160_v6, %v159_v5  ;;  %v191_v9 = vld [vmem:[#allocation6 + $0x100] sm:$0xff]  ;;  %v192_v10 = vld [vmem:[#allocation6 + $0x108] sm:$0xff]  ;;  %1265 = vmatprep.subr.bf16.mxu0 %v1264_v3  ;;  %v209_v14 = vld [vmem:[#allocation6 + $0x190] sm:$0xff]  ;;  %v1268_v16 = vpack.c.bf16 %v178_v13, %v177_v11  ;;  %s1557_s21 = smov [#allocation11]  }
  0x4d   :  { %v1298_v12 = vpack.c.bf16 %v192_v10, %v191_v9  ;;  %v210_v15 = vld [vmem:[#allocation6 + $0x198] sm:$0xff]  ;;  %1297 = vmatprep.subr.bf16.mxu1 %v1296_v7  ;;  %v161_v18 = vld [vmem:[#allocation6 + $0x10] sm:$0xff]  ;;  %v179_v23 = vld [vmem:[#allocation6 + $0xa0] sm:$0xff]  ;;  %s951_s22 = sshll.u32 %s1557_s21, 4  ;;  %s952_s22 = int_to_ptr.vmem [resolvable:$true] %s951_s22 }
  0x4e   :  { %1267 = vmatpush3.bf16.msra.mxu0 %v1266_v8  ;;  %v1300_v17 = vpack.c.bf16 %v210_v15, %v209_v14  ;;  %v162_v19 = vld [vmem:[#allocation6 + $0x18] sm:$0xff]  ;;  %v193_v20 = vld [vmem:[#allocation6 + $0x110] sm:$0xff]  ;;  %v180_v24 = vld [vmem:[#allocation6 + $0xa8] sm:$0xff]  ;;  %s1518_s23 = scalar_lea.vmem %s952_s22, 128  ;;  %p1523_p5 = scmp.lt.s32.totalorder %s952_s22, %s952_s22 }
  0x4f   :  { %1299 = vmatpush3.bf16.msra.mxu1 %v1298_v12  ;;  %v1270_v21 = vpack.c.bf16 %v162_v19, %v161_v18  ;;  %v194_v22 = vld [vmem:[#allocation6 + $0x118] sm:$0xff]  ;;  %1269 = vmatprep.subr.bf16.mxu0 %v1268_v16  ;;  %v1272_v26 = vpack.c.bf16 %v180_v24, %v179_v23  ;;  %v211_v27 = vld [vmem:[#allocation6 + $0x1a0] sm:$0xff]  ;;  %v212_v28 = vld [vmem:[#allocation6 + $0x1a8] sm:$0xff]  ;;  %p1519_p4 = scmp.ne.s32.totalorder %s952_s22, %s1518_s23  ;;  %p1524_p6 = scmp.lt.s32.totalorder %s1518_s23, %s1518_s23 }
  0x50   :  { %1301 = vmatprep.subr.bf16.mxu1 %v1300_v17  ;;  %v1302_v25 = vpack.c.bf16 %v194_v22, %v193_v20  ;;  %v163_v29 = vld [vmem:[#allocation6 + $0x20] sm:$0xff]  ;;  %v1304_v30 = vpack.c.bf16 %v212_v28, %v211_v27  ;;  %v164_v31 = vld [vmem:[#allocation6 + $0x28] sm:$0xff]  ;;  %v181_v35 = vld [vmem:[#allocation6 + $0xb0] sm:$0xff] }
  0x51   :  { %v195_v32 = vld [vmem:[#allocation6 + $0x120] sm:$0xff]  ;;  %v196_v33 = vld [vmem:[#allocation6 + $0x128] sm:$0xff]  ;;  %v1274_v34 = vpack.c.bf16 %v164_v31, %v163_v29  ;;  %v182_v36 = vld [vmem:[#allocation6 + $0xb8] sm:$0xff]  ;;  %p1525_p7 = por %p1524_p6, %p1523_p5 }
  0x52   :  { %1271 = vmatpush3.bf16.msra.mxu0 %v1270_v21  ;;  %v213_v37 = vld [vmem:[#allocation6 + $0x1b0] sm:$0xff]  ;;  %v1306_v38 = vpack.c.bf16 %v196_v33, %v195_v32  ;;  %v1276_v39 = vpack.c.bf16 %v182_v36, %v181_v35  ;;  %v214_v40 = vld [vmem:[#allocation6 + $0x1b8] sm:$0xff]  ;;  %v183_v46 = vld [vmem:[#allocation6 + $0xc0] sm:$0xff] }
  0x53   :  { %1303 = vmatpush3.bf16.msra.mxu1 %v1302_v25  ;;  %1273 = vmatprep.subr.bf16.mxu0 %v1272_v26  ;;  %v165_v41 = vld [vmem:[#allocation6 + $0x30] sm:$0xff]  ;;  %v166_v42 = vld [vmem:[#allocation6 + $0x38] sm:$0xff]  ;;  %v1308_v43 = vpack.c.bf16 %v214_v40, %v213_v37  ;;  %v184_v47 = vld [vmem:[#allocation6 + $0xc8] sm:$0xff]  ;;  %p1526_p8 = pnand %p1525_p7, %p1519_p4 }
  0x54   :  { %1305 = vmatprep.subr.bf16.mxu1 %v1304_v30  ;;  %v197_v44 = vld [vmem:[#allocation6 + $0x130] sm:$0xff]  ;;  %v198_v45 = vld [vmem:[#allocation6 + $0x138] sm:$0xff]  ;;  %v215_v48 = vld [vmem:[#allocation6 + $0x1c0] sm:$0xff]  ;;  %v1278_v50 = vpack.c.bf16 %v166_v42, %v165_v41  ;;  %v1280_v52 = vpack.c.bf16 %v184_v47, %v183_v46 }
  0x55   :  { %v216_v49 = vld [vmem:[#allocation6 + $0x1c8] sm:$0xff]  ;;  %v1310_v51 = vpack.c.bf16 %v198_v45, %v197_v44  ;;  %v167_v53 = vld [vmem:[#allocation6 + $0x40] sm:$0xff]  ;;  %v185_v58 = vld [vmem:[#allocation6 + $0xd0] sm:$0xff] }
  0x56   :  { %1275 = vmatpush3.bf16.msra.mxu0 %v1274_v34  ;;  %v168_v54 = vld [vmem:[#allocation6 + $0x48] sm:$0xff]  ;;  %v199_v55 = vld [vmem:[#allocation6 + $0x140] sm:$0xff]  ;;  %v1312_v56 = vpack.c.bf16 %v216_v49, %v215_v48  ;;  %v186_v59 = vld [vmem:[#allocation6 + $0xd8] sm:$0xff] }
  0x57   :  { %1307 = vmatpush3.bf16.msra.mxu1 %v1306_v38  ;;  %1277 = vmatprep.subr.bf16.mxu0 %v1276_v39  ;;  %v200_v57 = vld [vmem:[#allocation6 + $0x148] sm:$0xff]  ;;  %v217_v60 = vld [vmem:[#allocation6 + $0x1d0] sm:$0xff]  ;;  %v218_v61 = vld [vmem:[#allocation6 + $0x1d8] sm:$0xff]  ;;  %v1282_v62 = vpack.c.bf16 %v168_v54, %v167_v53  ;;  %v1284_v0 = vpack.c.bf16 %v186_v59, %v185_v58 }
  0x58   :  { %1309 = vmatprep.subr.bf16.mxu1 %v1308_v43  ;;  %v1314_v63 = vpack.c.bf16 %v200_v57, %v199_v55  ;;  %v169_v1 = vld [vmem:[#allocation6 + $0x50] sm:$0xff]  ;;  %v170_v2 = vld [vmem:[#allocation6 + $0x58] sm:$0xff]  ;;  %v1316_v4 = vpack.c.bf16 %v218_v61, %v217_v60  ;;  %v187_v6 = vld [vmem:[#allocation6 + $0xe0] sm:$0xff] }
  0x59   :  { %v201_v3 = vld [vmem:[#allocation6 + $0x150] sm:$0xff]  ;;  %v202_v5 = vld [vmem:[#allocation6 + $0x158] sm:$0xff]  ;;  %v188_v7 = vld [vmem:[#allocation6 + $0xe8] sm:$0xff]  ;;  %v1286_v10 = vpack.c.bf16 %v170_v2, %v169_v1 }
  0x5a   :  { %1279 = vmatpush3.bf16.msra.mxu0 %v1278_v50  ;;  %v219_v8 = vld [vmem:[#allocation6 + $0x1e0] sm:$0xff]  ;;  %v220_v9 = vld [vmem:[#allocation6 + $0x1e8] sm:$0xff]  ;;  %v1318_v13 = vpack.c.bf16 %v202_v5, %v201_v3  ;;  %v1288_v14 = vpack.c.bf16 %v188_v7, %v187_v6  ;;  %v189_v20 = vld [vmem:[#allocation6 + $0xf0] sm:$0xff] }
  0x5b   :  { %1311 = vmatpush3.bf16.msra.mxu1 %v1310_v51  ;;  %1281 = vmatprep.subr.bf16.mxu0 %v1280_v52  ;;  %v171_v11 = vld [vmem:[#allocation6 + $0x60] sm:$0xff]  ;;  %v172_v12 = vld [vmem:[#allocation6 + $0x68] sm:$0xff]  ;;  %v1320_v18 = vpack.c.bf16 %v220_v9, %v219_v8  ;;  %v190_v21 = vld [vmem:[#allocation6 + $0xf8] sm:$0xff] }
  0x5c   :  { %1313 = vmatprep.subr.bf16.mxu1 %v1312_v56  ;;  %v203_v15 = vld [vmem:[#allocation6 + $0x160] sm:$0xff]  ;;  %v204_v19 = vld [vmem:[#allocation6 + $0x168] sm:$0xff]  ;;  %v221_v22 = vld [vmem:[#allocation6 + $0x1f0] sm:$0xff]  ;;  %v1290_v24 = vpack.c.bf16 %v172_v12, %v171_v11  ;;  %v1292_v26 = vpack.c.bf16 %v190_v21, %v189_v20 }
  0x5d   :  { %v95_v16 = vld [vmem:[#allocation3 + $0x1] sm:$0xff]  ;;  %v222_v23 = vld [vmem:[#allocation6 + $0x1f8] sm:$0xff]  ;;  %v1322_v25 = vpack.c.bf16 %v204_v19, %v203_v15  ;;  %v173_v27 = vld [vmem:[#allocation6 + $0x70] sm:$0xff] }
  0x5e   :  { %1283 = vmatpush3.bf16.msra.mxu0 %v1282_v62  ;;  %v127_v17 = vld [vmem:[#allocation3 + $0x3] sm:$0xff]  ;;  %303 = vmatprep.mubr.f32.mxu0 %v95_v16  ;;  %v174_v28 = vld [vmem:[#allocation6 + $0x78] sm:$0xff]  ;;  %v205_v29 = vld [vmem:[#allocation6 + $0x170] sm:$0xff]  ;;  %v1324_v30 = vpack.c.bf16 %v222_v23, %v221_v22 }
  0x5f   :  { %1315 = vmatpush3.bf16.msra.mxu1 %v1314_v63  ;;  %1285 = vmatprep.subr.bf16.mxu0 %v1284_v0  ;;  %v206_v31 = vld [vmem:[#allocation6 + $0x178] sm:$0xff]  ;;  %v223_v32 = vld [vmem:[#allocation6 + $0x200] sm:$0xff]  ;;  %v224_v33 = vld [vmem:[#allocation6 + $0x208] sm:$0xff]  ;;  %v1294_v34 = vpack.c.bf16 %v174_v28, %v173_v27 }
  0x60   :  { %1317 = vmatprep.subr.bf16.mxu1 %v1316_v4  ;;  %448 = vmatprep.mubr.f32.mxu1 %v127_v17  ;;  %v1326_v35 = vpack.c.bf16 %v206_v31, %v205_v29  ;;  %v1328_v36 = vpack.c.bf16 %v224_v33, %v223_v32  ;;  %v225_v37 = vld [vmem:[#allocation6 + $0x210] sm:$0xff]  ;;  %v226_v38 = vld [vmem:[#allocation6 + $0x218] sm:$0xff]  ;;  %v79_v39 = vld [vmem:[#allocation3] sm:$0xff] }
  0x61   :  { %v111_v40 = vld [vmem:[#allocation3 + $0x2] sm:$0xff]  ;;  %v128_v42 = vld [vmem:[#allocation3 + $0xb] sm:$0xff]  ;;  %v1332_v43 = vpack.c.bf16 %v226_v38, %v225_v37  ;;  %v97_v48 = vld [vmem:[#allocation3 + $0x19] sm:$0xff] }
  0x62   :  { %1287 = vmatpush3.bf16.msra.mxu0 %v1286_v10  ;;  %v96_v41 = vld [vmem:[#allocation3 + $0x9] sm:$0xff]  ;;  %v227_v44 = vld [vmem:[#allocation6 + $0x220] sm:$0xff]  ;;  %v230_v52 = vld [vmem:[#allocation6 + $0x238] sm:$0xff] }
  0x63   :  { %1319 = vmatpush3.bf16.msra.mxu1 %v1318_v13  ;;  %1289 = vmatprep.subr.bf16.mxu0 %v1288_v14  ;;  %v228_v45 = vld [vmem:[#allocation6 + $0x228] sm:$0xff]  ;;  %v129_v49 = vld [vmem:[#allocation3 + $0x1b] sm:$0xff]  ;;  %v229_v51 = vld [vmem:[#allocation6 + $0x230] sm:$0xff] }
  0x64   :  { %1321 = vmatprep.subr.bf16.mxu1 %v1320_v18  ;;  %v80_v46 = vld [vmem:[#allocation3 + $0x8] sm:$0xff]  ;;  %v1336_v50 = vpack.c.bf16 %v228_v45, %v227_v44  ;;  %v81_v53 = vld [vmem:[#allocation3 + $0x18] sm:$0xff]  ;;  %v1340_v57 = vpack.c.bf16 %v230_v52, %v229_v51  ;;  %v231_v58 = vld [vmem:[#allocation6 + $0x240] sm:$0xff] }
  0x65   :  { %v112_v47 = vld [vmem:[#allocation3 + $0xa] sm:$0xff]  ;;  %v113_v54 = vld [vmem:[#allocation3 + $0x1a] sm:$0xff]  ;;  %v114_v61 = vld [vmem:[#allocation3 + $0x22] sm:$0xff] }
  0x66   :  { %1291 = vmatpush3.bf16.msra.mxu0 %v1290_v24  ;;  %v98_v55 = vld [vmem:[#allocation3 + $0x21] sm:$0xff]  ;;  %v99_v62 = vld [vmem:[#allocation3 + $0x31] sm:$0xff]  ;;  %v100_v5 = vld [vmem:[#allocation3 + $0x39] sm:$0xff] }
  0x67   :  { %1323 = vmatpush3.bf16.msra.mxu1 %v1322_v25  ;;  %1293 = vmatprep.subr.bf16.mxu0 %v1292_v26  ;;  %v130_v56 = vld [vmem:[#allocation3 + $0x23] sm:$0xff]  ;;  %v131_v63 = vld [vmem:[#allocation3 + $0x33] sm:$0xff]  ;;  %v132_v6 = vld [vmem:[#allocation3 + $0x3b] sm:$0xff] }
  0x68   :  { %1325 = vmatprep.subr.bf16.mxu1 %v1324_v30  ;;  %v232_v59 = vld [vmem:[#allocation6 + $0x248] sm:$0xff]  ;;  %v82_v60 = vld [vmem:[#allocation3 + $0x20] sm:$0xff]  ;;  %v233_v1 = vld [vmem:[#allocation6 + $0x250] sm:$0xff] }
  0x69   :  { %v1344_v0 = vpack.c.bf16 %v232_v59, %v231_v58  ;;  %v234_v2 = vld [vmem:[#allocation6 + $0x258] sm:$0xff]  ;;  %v83_v3 = vld [vmem:[#allocation3 + $0x30] sm:$0xff]  ;;  %v235_v8 = vld [vmem:[#allocation6 + $0x260] sm:$0xff] }
  0x6a   :  { %1295 = vmatpush3.bf16.msra.mxu0 %v1294_v34  ;;  %v115_v4 = vld [vmem:[#allocation3 + $0x32] sm:$0xff]  ;;  %v1348_v7 = vpack.c.bf16 %v234_v2, %v233_v1  ;;  %v236_v9 = vld [vmem:[#allocation6 + $0x268] sm:$0xff]  ;;  %v116_v11 = vld [vmem:[#allocation3 + $0x3a] sm:$0xff] }
  0x6b   :  { %1327 = vmatpush3.bf16.msra.mxu1 %v1326_v35  ;;  %1329 = vmatprep.subr.bf16.mxu0 %v1328_v36  ;;  %v84_v10 = vld [vmem:[#allocation3 + $0x38] sm:$0xff]  ;;  %v101_v12 = vld [vmem:[#allocation3 + $0x49] sm:$0xff]  ;;  %v1352_v14 = vpack.c.bf16 %v236_v9, %v235_v8  ;;  %v103_v24 = vld [vmem:[#allocation3 + $0x61] sm:$0xff] }
  0x6c   :  { %v133_v13 = vld [vmem:[#allocation3 + $0x4b] sm:$0xff]  ;;  %v238_v16 = vld [vmem:[#allocation6 + $0x278] sm:$0xff]  ;;  %v135_v25 = vld [vmem:[#allocation3 + $0x63] sm:$0xff] }
  0x6d   :  { %304 = vmatmul.mubr.f32.vlgmr.msra.gmra.mrb[0].mxu0 %v79_v39  ;;  %v237_v15 = vld [vmem:[#allocation6 + $0x270] sm:$0xff]  ;;  %v85_v17 = vld [vmem:[#allocation3 + $0x48] sm:$0xff]  ;;  %v87_v26 = vld [vmem:[#allocation3 + $0x60] sm:$0xff] }
  0x6e   :  { %449 = vmatmul.mubr.f32.vlgmr.msra.gmra.mrb[0].mxu1 %v111_v40  ;;  %1331 = vmatpush3.bf16.msra.mxu0 %v1328_v36  ;;  %v117_v18 = vld [vmem:[#allocation3 + $0x4a] sm:$0xff]  ;;  %v134_v20 = vld [vmem:[#allocation3 + $0x53] sm:$0xff]  ;;  %v1356_v21 = vpack.c.bf16 %v238_v16, %v237_v15  ;;  %v119_v27 = vld [vmem:[#allocation3 + $0x62] sm:$0xff] }
  0x6f   :  { %308 = vmatprep.mubr.f32.mxu0 %v96_v41  ;;  %453 = vmatprep.mubr.f32.mxu1 %v128_v42  ;;  %v102_v19 = vld [vmem:[#allocation3 + $0x51] sm:$0xff]  ;;  %v104_v28 = vld [vmem:[#allocation3 + $0x69] sm:$0xff]  ;;  %v105_v32 = vld [vmem:[#allocation3 + $0x79] sm:$0xff] }
  0x70   :  { %1333 = vmatprep.subr.bf16.mxu0 %v1332_v43  ;;  %v86_v22 = vld [vmem:[#allocation3 + $0x50] sm:$0xff]  ;;  %v88_v30 = vld [vmem:[#allocation3 + $0x68] sm:$0xff]  ;;  %v137_v33 = vld [vmem:[#allocation3 + $0x7b] sm:$0xff] }
  0x71   :  { %309 = vmatmul.mubr.f32.gmra.mrb[2].mxu0 %v80_v46  ;;  %v118_v23 = vld [vmem:[#allocation3 + $0x52] sm:$0xff]  ;;  %v120_v31 = vld [vmem:[#allocation3 + $0x6a] sm:$0xff]  ;;  %v121_v35 = vld [vmem:[#allocation3 + $0x7a] sm:$0xff] }
  0x72   :  { %454 = vmatmul.mubr.f32.gmra.mrb[2].mxu1 %v112_v47  ;;  %313 = vmatprep.mubr.f32.mxu0 %v97_v48  ;;  %v136_v29 = vld [vmem:[#allocation3 + $0x6b] sm:$0xff]  ;;  %v89_v34 = vld [vmem:[#allocation3 + $0x78] sm:$0xff]  ;;  %v106_v36 = vld [vmem:[#allocation3 + $0x81] sm:$0xff] }
  0x73   :  { %458 = vmatprep.mubr.f32.mxu1 %v129_v49  ;;  %1335 = vmatpush3.bf16.msra.mxu0 %v1332_v43  ;;  %v138_v37 = vld [vmem:[#allocation3 + $0x83] sm:$0xff]  ;;  %v107_v40 = vld [vmem:[#allocation3 + $0x91] sm:$0xff]  ;;  %v108_v44 = vld [vmem:[#allocation3 + $0x99] sm:$0xff] }
  0x74   :  { %1337 = vmatprep.subr.bf16.mxu0 %v1336_v50  ;;  %v90_v38 = vld [vmem:[#allocation3 + $0x80] sm:$0xff]  ;;  %v139_v41 = vld [vmem:[#allocation3 + $0x93] sm:$0xff]  ;;  %v109_v48 = vld [vmem:[#allocation3 + $0xa9] sm:$0xff] }
  0x75   :  { %314 = vmatmul.mubr.f32.gmra.mrb[4].mxu0 %v81_v53  ;;  %v122_v39 = vld [vmem:[#allocation3 + $0x82] sm:$0xff]  ;;  %v91_v42 = vld [vmem:[#allocation3 + $0x90] sm:$0xff]  ;;  %v92_v46 = vld [vmem:[#allocation3 + $0x98] sm:$0xff] }
  0x76   :  { %459 = vmatmul.mubr.f32.gmra.mrb[4].mxu1 %v113_v54  ;;  %318 = vmatprep.mubr.f32.mxu0 %v98_v55  ;;  %v123_v43 = vld [vmem:[#allocation3 + $0x92] sm:$0xff]  ;;  %v140_v45 = vld [vmem:[#allocation3 + $0x9b] sm:$0xff]  ;;  %v125_v51 = vld [vmem:[#allocation3 + $0xaa] sm:$0xff] }
  0x77   :  { %463 = vmatprep.mubr.f32.mxu1 %v130_v56  ;;  %1339 = vmatpush3.bf16.msra.mxu0 %v1336_v50  ;;  %v124_v47 = vld [vmem:[#allocation3 + $0x9a] sm:$0xff]  ;;  %v141_v49 = vld [vmem:[#allocation3 + $0xab] sm:$0xff] }
  0x78   :  { %1341 = vmatprep.subr.bf16.mxu0 %v1340_v57  ;;  %v93_v50 = vld [vmem:[#allocation3 + $0xa8] sm:$0xff]  ;;  %v110_v52 = vld [vmem:[#allocation3 + $0xb1] sm:$0xff]  ;;  %v145_v58 = vld [vmem:[#allocation3 + $0x1c] sm:$0xff] }
  0x79   :  { %319 = vmatmul.mubr.f32.gmra.mrb[6].mxu0 %v82_v60  ;;  %v142_v53 = vld [vmem:[#allocation3 + $0xb3] sm:$0xff]  ;;  %v143_v56 = vld [vmem:[#allocation3 + $0x4] sm:$0xff]  ;;  %v153_v2 = vld [vmem:[#allocation3 + $0x7c] sm:$0xff] }
  0x7a   :  { %464 = vmatmul.mubr.f32.gmra.mrb[6].mxu1 %v114_v61  ;;  %323 = vmatprep.mubr.f32.mxu0 %v99_v62  ;;  %v94_v54 = vld [vmem:[#allocation3 + $0xb0] sm:$0xff]  ;;  %v146_v59 = vld [vmem:[#allocation3 + $0x24] sm:$0xff]  ;;  %v148_v61 = vld [vmem:[#allocation3 + $0x3c] sm:$0xff] }
  0x7b   :  { %468 = vmatprep.mubr.f32.mxu1 %v131_v63  ;;  %1343 = vmatpush3.bf16.msra.mxu0 %v1340_v57  ;;  %v126_v55 = vld [vmem:[#allocation3 + $0xb2] sm:$0xff] }
  0x7c   :  { %1345 = vmatprep.subr.bf16.mxu0 %v1344_v0  ;;  %v144_v57 = vld [vmem:[#allocation3 + $0xc] sm:$0xff]  ;;  %v147_v60 = vld [vmem:[#allocation3 + $0x34] sm:$0xff] }
  0x7d   :  { %324 = vmatmul.mubr.f32.gmra.mrb[8].mxu0 %v83_v3  ;;  %v149_v62 = vld [vmem:[#allocation3 + $0x4c] sm:$0xff]  ;;  %v150_v63 = vld [vmem:[#allocation3 + $0x54] sm:$0xff]  ;;  %v154_v3 = vld [vmem:[#allocation3 + $0x84] sm:$0xff] }
  0x7e   :  { %469 = vmatmul.mubr.f32.gmra.mrb[8].mxu1 %v115_v4  ;;  %328 = vmatprep.mubr.f32.mxu0 %v100_v5  ;;  %v152_v1 = vld [vmem:[#allocation3 + $0x6c] sm:$0xff]  ;;  %v155_v4 = vld [vmem:[#allocation3 + $0x94] sm:$0xff]  ;;  %v156_v5 = vld [vmem:[#allocation3 + $0x9c] sm:$0xff] }
  0x7f   :  { %473 = vmatprep.mubr.f32.mxu1 %v132_v6  ;;  %1347 = vmatpush3.bf16.msra.mxu0 %v1344_v0  ;;  %v151_v0 = vld [vmem:[#allocation3 + $0x64] sm:$0xff]  ;;  %v157_v6 = vld [vmem:[#allocation3 + $0xac] sm:$0xff]  ;;  %v820_v9 = vld [vmem:[#allocation9 + $0x8] sm:$0xff] }
  0x80   :  { %1349 = vmatprep.subr.bf16.mxu0 %v1348_v7  ;;  %v819_v8 = vld [vmem:[#allocation9] sm:$0xff]  ;;  %v824_v16 = vld [vmem:[#allocation9 + $0x28] sm:$0xff] }
  0x81   :  { %329 = vmatmul.mubr.f32.gmra.mrb[10].mxu0 %v84_v10  ;;  %v1554_v10 = vmov 0.0|0.0   ;;  %v823_v15 = vld [vmem:[#allocation9 + $0x20] sm:$0xff] }
  0x82   :  { %474 = vmatmul.mubr.f32.gmra.mrb[10].mxu1 %v116_v11  ;;  %333 = vmatprep.mubr.f32.mxu0 %v101_v12  ;;  %v1361_v11 = vpack.c.bf16 %v820_v9, %v819_v8  ;;  %v821_v12 = vld [vmem:[#allocation9 + $0x10] sm:$0xff] }
  0x83   :  { %478 = vmatprep.mubr.f32.mxu1 %v133_v13  ;;  %1351 = vmatpush3.bf16.msra.mxu0 %v1348_v7  ;;  %v158_v7 = vld [vmem:[#allocation3 + $0xb4] sm:$0xff]  ;;  %v822_v13 = vld [vmem:[#allocation9 + $0x18] sm:$0xff] }
  0x84   :  { %1353 = vmatprep.subr.bf16.mxu0 %v1352_v14  ;;  %1360 = vmatprep.subr.bf16.mxu1 %v1554_v10 }
  0x85   :  { %334 = vmatmul.mubr.f32.gmra.mrb[12].mxu0 %v85_v17  ;;  %1362 = vmatpush3.bf16.msra.mxu1 %v1361_v11  ;;  %v1367_v17 = vpack.c.bf16 %v824_v16, %v823_v15 }
  0x86   :  { %479 = vmatmul.mubr.f32.gmra.mrb[12].mxu1 %v117_v18  ;;  %338 = vmatprep.mubr.f32.mxu0 %v102_v19  ;;  %v825_v18 = vld [vmem:[#allocation9 + $0x30] sm:$0xff]  ;;  %v826_v19 = vld [vmem:[#allocation9 + $0x38] sm:$0xff] }
  0x87   :  { %483 = vmatprep.mubr.f32.mxu1 %v134_v20  ;;  %1355 = vmatpush3.bf16.msra.mxu0 %v1352_v14  ;;  %v1364_v14 = vpack.c.bf16 %v822_v13, %v821_v12  ;;  %v1370_v20 = vpack.c.bf16 %v826_v19, %v825_v18 }
  0x88   :  { %1357 = vmatprep.subr.bf16.mxu0 %v1356_v21  ;;  %1363 = vmatprep.subr.bf16.mxu1 %v1554_v10 }
  0x89   :  { %339 = vmatmul.mubr.f32.gmra.mrb[14].mxu0 %v86_v22  ;;  %1365 = vmatpush3.bf16.msra.mxu1 %v1364_v14  ;;  %v828_v22 = vld [vmem:[#allocation9 + $0x48] sm:$0xff] }
  0x8a   :  { %484 = vmatmul.mubr.f32.gmra.mrb[14].mxu1 %v118_v23  ;;  %343 = vmatprep.mubr.f32.mxu0 %v103_v24  ;;  %v829_v24 = vld [vmem:[#allocation9 + $0x50] sm:$0xff] }
  0x8b   :  { %488 = vmatprep.mubr.f32.mxu1 %v135_v25  ;;  %1359 = vmatpush3.bf16.msra.mxu0 %v1356_v21  ;;  %v827_v21 = vld [vmem:[#allocation9 + $0x40] sm:$0xff]  ;;  %v830_v25 = vld [vmem:[#allocation9 + $0x58] sm:$0xff] }
  0x8c   :  { %1366 = vmatprep.subr.bf16.mxu1 %v1554_v10  ;;  %v1373_v23 = vpack.c.bf16 %v828_v22, %v827_v21 }
  0x8d   :  { %344 = vmatmul.mubr.f32.gmra.mrb[16].mxu0 %v87_v26  ;;  %1368 = vmatpush3.bf16.msra.mxu1 %v1367_v17  ;;  %v1376_v26 = vpack.c.bf16 %v830_v25, %v829_v24 }
  0x8e   :  { %489 = vmatmul.mubr.f32.gmra.mrb[16].mxu1 %v119_v27  ;;  %348 = vmatprep.mubr.f32.mxu0 %v104_v28  ;;  %v831_v27 = vld [vmem:[#allocation9 + $0x60] sm:$0xff]  ;;  %v832_v28 = vld [vmem:[#allocation9 + $0x68] sm:$0xff] }
  0x8f   :  { %493 = vmatprep.mubr.f32.mxu1 %v136_v29  ;;  %1369 = vmatprep.subr.bf16.mxu1 %v1554_v10  ;;  %v1556_v29 = vmov 0.0  }
  0x91   :  { %349 = vmatmul.mubr.f32.gmra.mrb[18].mxu0 %v88_v30  ;;  %1371 = vmatpush3.bf16.msra.mxu1 %v1370_v20  ;;  %v1379_v30 = vpack.c.bf16 %v832_v28, %v831_v27 }
  0x92   :  { %494 = vmatmul.mubr.f32.gmra.mrb[18].mxu1 %v120_v31  ;;  %353 = vmatprep.mubr.f32.mxu0 %v105_v32  ;;  %v833_v31 = vld [vmem:[#allocation9 + $0x70] sm:$0xff]  ;;  %v834_v32 = vld [vmem:[#allocation9 + $0x78] sm:$0xff] }
  0x93   :  { %498 = vmatprep.mubr.f32.mxu1 %v137_v33  ;;  %1372 = vmatprep.subr.bf16.mxu1 %v1554_v10  ;;  %v1382_v33 = vpack.c.bf16 %v834_v32, %v833_v31 }
  0x95   :  { %354 = vmatmul.mubr.f32.gmra.mrb[20].mxu0 %v89_v34  ;;  %1374 = vmatpush3.bf16.msra.mxu1 %v1373_v23 }
  0x96   :  { %499 = vmatmul.mubr.f32.gmra.mrb[20].mxu1 %v121_v35  ;;  %358 = vmatprep.mubr.f32.mxu0 %v106_v36 }
  0x97   :  { %503 = vmatprep.mubr.f32.mxu1 %v138_v37  ;;  %1375 = vmatprep.subr.bf16.mxu1 %v1554_v10 }
  0x99   :  { %359 = vmatmul.mubr.f32.gmra.mrb[22].mxu0 %v90_v38  ;;  %1377 = vmatpush3.bf16.msra.mxu1 %v1376_v26 }
  0x9a   :  { %504 = vmatmul.mubr.f32.gmra.mrb[22].mxu1 %v122_v39  ;;  %363 = vmatprep.mubr.f32.mxu0 %v107_v40 }
  0x9b   :  { %508 = vmatprep.mubr.f32.mxu1 %v139_v41  ;;  %1378 = vmatprep.subr.bf16.mxu1 %v1554_v10 }
  0x9d   :  { %364 = vmatmul.mubr.f32.gmra.mrb[24].mxu0 %v91_v42  ;;  %1380 = vmatpush3.bf16.msra.mxu1 %v1379_v30 }
  0x9e   :  { %509 = vmatmul.mubr.f32.gmra.mrb[24].mxu1 %v123_v43  ;;  %368 = vmatprep.mubr.f32.mxu0 %v108_v44 }
  0x9f   :  { %513 = vmatprep.mubr.f32.mxu1 %v140_v45  ;;  %1381 = vmatprep.subr.bf16.mxu1 %v1554_v10 }
  0xa1   :  { %369 = vmatmul.mubr.f32.gmra.mrb[26].mxu0 %v92_v46  ;;  %1383 = vmatpush3.bf16.msra.mxu1 %v1382_v33 }
  0xa2   :  { %514 = vmatmul.mubr.f32.gmra.mrb[26].mxu1 %v124_v47  ;;  %373 = vmatprep.mubr.f32.mxu0 %v109_v48 }
  0xa3   :  { %518 = vmatprep.mubr.f32.mxu1 %v141_v49 }
  0xa5   :  { %374 = vmatmul.mubr.f32.gmra.mrb[28].mxu0 %v93_v50 }
  0xa6   :  { %519 = vmatmul.mubr.f32.gmra.mrb[28].mxu1 %v125_v51  ;;  %378 = vmatprep.mubr.f32.mxu0 %v110_v52 }
  0xa7   :  { %523 = vmatprep.mubr.f32.mxu1 %v142_v53 }
  0xa9   :  { %379 = vmatmul.mubr.f32.gmra.mrb[30].mxu0 %v94_v54 }
  0xaa   :  { %524 = vmatmul.mubr.f32.gmra.mrb[30].mxu1 %v126_v55  ;;  %1205 = vmatprep.mubr.f32.mxu0 %v143_v56 }
  0xab   :  { %1261 = vmatprep.mubr.msk.f32.mxu1 %vm1555_vm0, %v1556_v29 }
  0xad   :  { %1206 = vmatmul.mubr.f32.vlgmr.msra.gmra.mrb[32].mxu0 %v144_v57 }
  0xae   :  { %1208 = vmatprep.mubr.f32.mxu0 %v145_v58 }
  0xb1   :  { %1209 = vmatmul.mubr.f32.gmra.mrb[34].mxu0 %v146_v59 }
  0xb2   :  { %1211 = vmatprep.mubr.f32.mxu0 %v147_v60 }
  0xb5   :  { %1212 = vmatmul.mubr.f32.gmra.mrb[36].mxu0 %v148_v61 }
  0xb6   :  { %1214 = vmatprep.mubr.f32.mxu0 %v149_v62 }
  0xb9   :  { %1215 = vmatmul.mubr.f32.gmra.mrb[38].mxu0 %v150_v63 }
  0xba   :  { %1217 = vmatprep.mubr.f32.mxu0 %v151_v0 }
  0xbd   :  { %1218 = vmatmul.mubr.f32.gmra.mrb[40].mxu0 %v152_v1 }
  0xbe   :  { %1220 = vmatprep.mubr.f32.mxu0 %v153_v2 }
  0xc1   :  { %1221 = vmatmul.mubr.f32.gmra.mrb[42].mxu0 %v154_v3 }
  0xc2   :  { %1223 = vmatprep.mubr.f32.mxu0 %v155_v4 }
  0xc5   :  { %1224 = vmatmul.mubr.f32.gmra.mrb[44].mxu0 %v156_v5 }
  0xc6   :  { %1226 = vmatprep.mubr.f32.mxu0 %v157_v6 }
  0xc9   :  { %1227 = vmatmul.mubr.f32.gmra.mrb[46].mxu0 %v158_v7 }
 0x140   :  { %v996_v34 = vpop.f32.mrb[0].mxu0 }
 0x141   :  { %v1076_v35 = vpop.f32.mrb[0].mxu1  ;;  %v997_v36 = vpop.f32.mrb[1].mxu0 }
 0x142   :  { %v998_v37 = vadd.f32 %v997_v36, %v996_v34  ;;  %v1077_v38 = vpop.f32.mrb[1].mxu1 }
 0x143   :  { %v1078_v39 = vadd.f32 %v1077_v38, %v1076_v35 }
 0x144   :  { %v999_v40 = vpop.f32.mrb[2].mxu0 }
 0x145   :  { %v1079_v41 = vpop.f32.mrb[2].mxu1  ;;  %v1000_v42 = vpop.f32.mrb[3].mxu0  ;;  %v1667_v43 = vadd.f32 %v1078_v39, %v998_v37 }
 0x146   :  { %v1001_v44 = vadd.f32 %v1000_v42, %v999_v40  ;;  %v1080_v45 = vpop.f32.mrb[3].mxu1 }
 0x147   :  { %v1081_v46 = vadd.f32 %v1080_v45, %v1079_v41 }
 0x148   :  { %v1002_v47 = vpop.f32.mrb[4].mxu0 }
 0x149   :  { %v1082_v48 = vpop.f32.mrb[4].mxu1  ;;  %v1003_v49 = vpop.f32.mrb[5].mxu0  ;;  %v1669_v50 = vadd.f32 %v1081_v46, %v1001_v44 }
 0x14a   :  { %v1004_v51 = vadd.f32 %v1003_v49, %v1002_v47  ;;  %v1083_v52 = vpop.f32.mrb[5].mxu1 }
 0x14b   :  { %v1084_v53 = vadd.f32 %v1083_v52, %v1082_v48 }
 0x14c   :  { %v1005_v54 = vpop.f32.mrb[6].mxu0 }
 0x14d   :  { %v1085_v55 = vpop.f32.mrb[6].mxu1  ;;  %v1006_v56 = vpop.f32.mrb[7].mxu0  ;;  %v1671_v57 = vadd.f32 %v1084_v53, %v1004_v51 }
 0x14e   :  { %v1007_v58 = vadd.f32 %v1006_v56, %v1005_v54  ;;  %v1086_v59 = vpop.f32.mrb[7].mxu1 }
 0x14f   :  { %v1087_v60 = vadd.f32 %v1086_v59, %v1085_v55 }
 0x150   :  { %v1008_v61 = vpop.f32.mrb[8].mxu0 }
 0x151   :  { %v1088_v62 = vpop.f32.mrb[8].mxu1  ;;  %v1009_v63 = vpop.f32.mrb[9].mxu0  ;;  %v1673_v0 = vadd.f32 %v1087_v60, %v1007_v58 }
 0x152   :  { %v1010_v1 = vadd.f32 %v1009_v63, %v1008_v61  ;;  %v1089_v2 = vpop.f32.mrb[9].mxu1 }
 0x153   :  { %v1090_v3 = vadd.f32 %v1089_v2, %v1088_v62 }
 0x154   :  { %v1011_v4 = vpop.f32.mrb[10].mxu0 }
 0x155   :  { %v1091_v5 = vpop.f32.mrb[10].mxu1  ;;  %v1012_v6 = vpop.f32.mrb[11].mxu0  ;;  %v1675_v7 = vadd.f32 %v1090_v3, %v1010_v1 }
 0x156   :  { %v1013_v8 = vadd.f32 %v1012_v6, %v1011_v4  ;;  %v1092_v9 = vpop.f32.mrb[11].mxu1 }
 0x157   :  { %v1093_v10 = vadd.f32 %v1092_v9, %v1091_v5 }
 0x158   :  { %v1014_v11 = vpop.f32.mrb[12].mxu0 }
 0x159   :  { %v1094_v12 = vpop.f32.mrb[12].mxu1  ;;  %v1015_v13 = vpop.f32.mrb[13].mxu0  ;;  %v1677_v14 = vadd.f32 %v1093_v10, %v1013_v8 }
 0x15a   :  { %v1016_v15 = vadd.f32 %v1015_v13, %v1014_v11  ;;  %v1095_v16 = vpop.f32.mrb[13].mxu1 }
 0x15b   :  { %v1096_v17 = vadd.f32 %v1095_v16, %v1094_v12 }
 0x15c   :  { %v1017_v18 = vpop.f32.mrb[14].mxu0 }
 0x15d   :  { %v1097_v19 = vpop.f32.mrb[14].mxu1  ;;  %v1018_v20 = vpop.f32.mrb[15].mxu0  ;;  %v1679_v21 = vadd.f32 %v1096_v17, %v1016_v15 }
 0x15e   :  { %v1019_v22 = vadd.f32 %v1018_v20, %v1017_v18  ;;  %v1098_v23 = vpop.f32.mrb[15].mxu1 }
 0x15f   :  { %v1099_v24 = vadd.f32 %v1098_v23, %v1097_v19 }
 0x160   :  { %v1020_v25 = vpop.f32.mrb[16].mxu0 }
 0x161   :  { %v1100_v26 = vpop.f32.mrb[16].mxu1  ;;  %v1021_v27 = vpop.f32.mrb[17].mxu0  ;;  %v1681_v28 = vadd.f32 %v1099_v24, %v1019_v22 }
 0x162   :  { %v1022_v29 = vadd.f32 %v1021_v27, %v1020_v25  ;;  %v1101_v30 = vpop.f32.mrb[17].mxu1  ;;  %v1700_v25 = vld [vmem:[%s1773_s2] ss:$0 sm:$0xff] }
 0x163   :  { %v1102_v31 = vadd.f32 %v1101_v30, %v1100_v26 }
 0x164   :  { %v1023_v32 = vpop.f32.mrb[18].mxu0 }
 0x165   :  { %v1103_v33 = vpop.f32.mrb[18].mxu1  ;;  %v1024_v34 = vpop.f32.mrb[19].mxu0  ;;  %v1683_v35 = vadd.f32 %v1102_v31, %v1022_v29 }
 0x166   :  { %v1025_v36 = vadd.f32 %v1024_v34, %v1023_v32  ;;  %v1104_v37 = vpop.f32.mrb[19].mxu1 }
 0x167   :  { %v1105_v38 = vadd.f32 %v1104_v37, %v1103_v33 }
 0x168   :  { %v1026_v39 = vpop.f32.mrb[20].mxu0 }
 0x169   :  { %v1106_v40 = vpop.f32.mrb[20].mxu1  ;;  %v1027_v41 = vpop.f32.mrb[21].mxu0  ;;  %v1685_v42 = vadd.f32 %v1105_v38, %v1025_v36 }
 0x16a   :  { %v1028_v44 = vadd.f32 %v1027_v41, %v1026_v39  ;;  %v1107_v45 = vpop.f32.mrb[21].mxu1 }
 0x16b   :  { %v1108_v46 = vadd.f32 %v1107_v45, %v1106_v40 }
 0x16c   :  { %v1029_v47 = vpop.f32.mrb[22].mxu0 }
 0x16d   :  { %v1109_v48 = vpop.f32.mrb[22].mxu1  ;;  %v1030_v49 = vpop.f32.mrb[23].mxu0  ;;  %v1687_v51 = vadd.f32 %v1108_v46, %v1028_v44  ;;  %v1716_v46 = vld [vmem:[#allocation8 + $0x8] sm:$0xff] }
 0x16e   :  { %v1031_v52 = vadd.f32 %v1030_v49, %v1029_v47  ;;  %v1110_v53 = vpop.f32.mrb[23].mxu1 }
 0x16f   :  { %v1111_v54 = vadd.f32 %v1110_v53, %v1109_v48  ;;  %v1719_v48 = vld [vmem:[#allocation8] sm:$0xff] }
 0x170   :  { %v1032_v55 = vpop.f32.mrb[24].mxu0 }
 0x171   :  { %v1112_v56 = vpop.f32.mrb[24].mxu1  ;;  %v1033_v58 = vpop.f32.mrb[25].mxu0  ;;  %v1689_v59 = vadd.f32 %v1111_v54, %v1031_v52 }
 0x172   :  { %v1034_v60 = vadd.f32 %v1033_v58, %v1032_v55  ;;  %v1113_v61 = vpop.f32.mrb[25].mxu1 }
 0x173   :  { %v1114_v62 = vadd.f32 %v1113_v61, %v1112_v56 }
 0x174   :  { %v1035_v63 = vpop.f32.mrb[26].mxu0 }
 0x175   :  { %v1115_v1 = vpop.f32.mrb[26].mxu1  ;;  %v1036_v2 = vpop.f32.mrb[27].mxu0  ;;  %v1691_v3 = vadd.f32 %v1114_v62, %v1034_v60 }
 0x176   :  { %v1037_v4 = vadd.f32 %v1036_v2, %v1035_v63  ;;  %v1116_v5 = vpop.f32.mrb[27].mxu1 }
 0x177   :  { %v1117_v6 = vadd.f32 %v1116_v5, %v1115_v1 }
 0x178   :  { %v1038_v8 = vpop.f32.mrb[28].mxu0 }
 0x179   :  { %v1118_v9 = vpop.f32.mrb[28].mxu1  ;;  %v1039_v10 = vpop.f32.mrb[29].mxu0  ;;  %v1693_v11 = vadd.f32 %v1117_v6, %v1037_v4 }
 0x17a   :  { %v1040_v12 = vadd.f32 %v1039_v10, %v1038_v8  ;;  %v1119_v13 = vpop.f32.mrb[29].mxu1 }
 0x17b   :  { %v1120_v15 = vadd.f32 %v1119_v13, %v1118_v9 }
 0x17c   :  { %v1041_v16 = vpop.f32.mrb[30].mxu0 }
 0x17d   :  { %v1121_v17 = vpop.f32.mrb[30].mxu1  ;;  %v1042_v18 = vpop.f32.mrb[31].mxu0  ;;  %v1695_v19 = vadd.f32 %v1120_v15, %v1040_v12 }
 0x17e   :  { %v1043_v20 = vadd.f32 %v1042_v18, %v1041_v16  ;;  %v1122_v22 = vpop.f32.mrb[31].mxu1 }
 0x17f   :  { %v1123_v23 = vadd.f32 %v1122_v22, %v1121_v17 }
 0x180   :  { %v1207_v24 = vpop.f32.mrb[32].mxu0 }
 0x181   :  { %v601_v26 = vadd.f32 %v1207_v24, %v1669_v50  ;;  %v595_v27 = vpop.f32.mrb[33].mxu0  ;;  %v1703_v29 = vadd.f32 %v1123_v23, %v1043_v20 }
 0x182   :  { %v596_v30 = vadd.f32 %v595_v27, %v1667_v43 }
 0x183   :  { %v682_v31 = vadd.f32 %v1700_v25, %v601_v26 }
 0x184   :  { %v681_v32 = vadd.f32 %v1700_v25, %v596_v30  ;;  %v1210_v33 = vpop.f32.mrb[34].mxu0 }
 0x185   :  { %1394 = vtanh.f32 %v682_v31  ;;  %v611_v34 = vadd.f32 %v1210_v33, %v1673_v0  ;;  %v605_v36 = vpop.f32.mrb[35].mxu0 }
 0x186   :  { %1396 = vtanh.f32 %v681_v32  ;;  %v606_v37 = vadd.f32 %v605_v36, %v1671_v57 }
 0x187   :  { %v684_v38 = vadd.f32 %v1700_v25, %v611_v34 }
 0x188   :  { %v683_v50 = vadd.f32 %v1700_v25, %v606_v37  ;;  %v1213_v39 = vpop.f32.mrb[36].mxu0 }
 0x189   :  { %1398 = vtanh.f32 %v684_v38  ;;  %v621_v43 = vadd.f32 %v1213_v39, %v1677_v14  ;;  %v615_v40 = vpop.f32.mrb[37].mxu0 }
 0x18a   :  { %1400 = vtanh.f32 %v683_v50  ;;  %v616_v41 = vadd.f32 %v615_v40, %v1675_v7 }
 0x18b   :  { %v686_v44 = vadd.f32 %v1700_v25, %v621_v43 }
 0x18c   :  { %v685_v0 = vadd.f32 %v1700_v25, %v616_v41  ;;  %v1216_v45 = vpop.f32.mrb[38].mxu0 }
 0x18d   :  { %1402 = vtanh.f32 %v686_v44  ;;  %v631_v57 = vadd.f32 %v1216_v45, %v1681_v28  ;;  %v625_v47 = vpop.f32.mrb[39].mxu0 }
 0x18e   :  { %1404 = vtanh.f32 %v685_v0  ;;  %v626_v14 = vadd.f32 %v625_v47, %v1679_v21 }
 0x18f   :  { %v1395_v49 = vpop.eup %1394  ;;  %v688_v52 = vadd.f32 %v1700_v25, %v631_v57 }
 0x190   :  { %v1397_v7 = vpop.eup %1396  ;;  %v716_v53 = vadd.f32 %v1395_v49, %v1716_v46  ;;  %v687_v54 = vadd.f32 %v1700_v25, %v626_v14  ;;  %v1219_v55 = vpop.f32.mrb[40].mxu0 }
 0x191   :  { %v715_v56 = vadd.f32 %v1397_v7, %v1719_v48  ;;  %1406 = vtanh.f32 %v688_v52  ;;  %v641_v28 = vadd.f32 %v1219_v55, %v1685_v42  ;;  %v635_v58 = vpop.f32.mrb[41].mxu0 }
 0x192   :  { %1408 = vtanh.f32 %v687_v54  ;;  %v636_v60 = vadd.f32 %v635_v58, %v1683_v35 }
 0x193   :  { %v1399_v61 = vpop.eup %1398  ;;  %v763_v21 = vmax.f32 %v715_v56, %v716_v53  ;;  %v690_v62 = vadd.f32 %v1700_v25, %v641_v28 }
 0x194   :  { %v1401_v63 = vpop.eup %1400  ;;  %v718_v1 = vadd.f32 %v1399_v61, %v1716_v46  ;;  %v689_v2 = vadd.f32 %v1700_v25, %v636_v60  ;;  %v1222_v4 = vpop.f32.mrb[42].mxu0 }
 0x195   :  { %v764_v5 = vrot.slane %v763_v21, 4  ;;  %v717_v6 = vadd.f32 %v1401_v63, %v1719_v48  ;;  %1410 = vtanh.f32 %v690_v62  ;;  %v651_v42 = vadd.f32 %v1222_v4, %v1689_v59  ;;  %v645_v8 = vpop.f32.mrb[43].mxu0 }
 0x196   :  { %1412 = vtanh.f32 %v689_v2  ;;  %v646_v35 = vadd.f32 %v645_v8, %v1687_v51 }
 0x197   :  { %v1403_v9 = vpop.eup %1402  ;;  %v765_v10 = vmax.f32 %v763_v21, %v764_v5  ;;  %v770_v12 = vmax.f32 %v717_v6, %v718_v1  ;;  %v692_v13 = vadd.f32 %v1700_v25, %v651_v42 }
 0x198   :  { %v1405_v15 = vpop.eup %1404  ;;  %v720_v16 = vadd.f32 %v1403_v9, %v1716_v46  ;;  %v691_v17 = vadd.f32 %v1700_v25, %v646_v35  ;;  %v1225_v18 = vpop.f32.mrb[44].mxu0 }
 0x199   :  { %v766_v20 = vrot.slane %v765_v10, 2  ;;  %v771_v22 = vrot.slane %v770_v12, 4  ;;  %v719_v23 = vadd.f32 %v1405_v15, %v1719_v48  ;;  %1414 = vtanh.f32 %v692_v13  ;;  %v655_v59 = vpop.f32.mrb[45].mxu0 }
 0x19a   :  { %1416 = vtanh.f32 %v691_v17  ;;  %v661_v51 = vadd.f32 %v1225_v18, %v1693_v11  ;;  %v656_v24 = vadd.f32 %v655_v59, %v1691_v3 }
 0x19b   :  { %v1407_v26 = vpop.eup %1406  ;;  %v767_v27 = vmax.f32 %v765_v10, %v766_v20  ;;  %v772_v30 = vmax.f32 %v770_v12, %v771_v22  ;;  %v777_v31 = vmax.f32 %v719_v23, %v720_v16 }
 0x19c   :  { %v1409_v32 = vpop.eup %1408  ;;  %v722_v33 = vadd.f32 %v1407_v26, %v1716_v46  ;;  %v694_v34 = vadd.f32 %v1700_v25, %v661_v51  ;;  %v693_v36 = vadd.f32 %v1700_v25, %v656_v24  ;;  %v1228_v37 = vpop.f32.mrb[46].mxu0 }
 0x19d   :  { %v773_v38 = vrot.slane %v772_v30, 2  ;;  %v778_v50 = vrot.slane %v777_v31, 4  ;;  %v721_v39 = vadd.f32 %v1409_v32, %v1719_v48  ;;  %v665_v43 = vpop.f32.mrb[47].mxu0  ;;  %v671_v3 = vadd.f32 %v1228_v37, %v1703_v29 }
 0x19e   :  { %1418 = vtanh.f32 %v694_v34  ;;  %v666_v11 = vadd.f32 %v665_v43, %v1695_v19  ;;  %v768_v41 = vrot.slane %v767_v27, 1 }
 0x19f   :  { %v1411_v40 = vpop.eup %1410  ;;  %v774_v44 = vmax.f32 %v772_v30, %v773_v38  ;;  %v779_v0 = vmax.f32 %v777_v31, %v778_v50  ;;  %v784_v45 = vmax.f32 %v721_v39, %v722_v33  ;;  %1420 = vtanh.f32 %v693_v36 }
 0x1a0   :  { %v1413_v57 = vpop.eup %1412  ;;  %v724_v47 = vadd.f32 %v1411_v40, %v1716_v46  ;;  %v696_v14 = vadd.f32 %v1700_v25, %v671_v3  ;;  %v695_v49 = vadd.f32 %v1700_v25, %v666_v11  ;;  %v769_v60 = vmax.f32 %v767_v27, %v768_v41 }
 0x1a1   :  { %v775_v52 = vrot.slane %v774_v44, 1  ;;  %v780_v7 = vrot.slane %v779_v0, 2  ;;  %v785_v53 = vrot.slane %v784_v45, 4  ;;  %v723_v29 = vadd.f32 %v1413_v57, %v1719_v48 }
 0x1a2   :  { %1422 = vtanh.f32 %v696_v14 }
 0x1a3   :  { %v1415_v19 = vpop.eup %1414  ;;  %v776_v54 = vmax.f32 %v774_v44, %v775_v52  ;;  %v781_v55 = vmax.f32 %v779_v0, %v780_v7  ;;  %v786_v56 = vmax.f32 %v784_v45, %v785_v53  ;;  %v791_v28 = vmax.f32 %v723_v29, %v724_v47  ;;  %v963_v47 = vld [vmem:[%s1776_s5] ss:$0 sm:$0xff] }
 0x1a4   :  { %v1417_v58 = vpop.eup %1416  ;;  %v726_v61 = vadd.f32 %v1415_v19, %v1716_v46  ;;  %1424 = vtanh.f32 %v695_v49 }
 0x1a5   :  { %v782_v21 = vrot.slane %v781_v55, 1  ;;  %v787_v62 = vrot.slane %v786_v56, 2  ;;  %v792_v25 = vrot.slane %v791_v28, 4  ;;  %v725_v63 = vadd.f32 %v1417_v58, %v1719_v48 }
 0x1a6   :  { %v851_v1 = vsel %vm850_vm1, %v776_v54, %v769_v60 }
 0x1a7   :  { %v788_v2 = vmax.f32 %v786_v56, %v787_v62  ;;  %v793_v4 = vmax.f32 %v791_v28, %v792_v25  ;;  %v798_v5 = vmax.f32 %v725_v63, %v726_v61  ;;  %v783_v6 = vmax.f32 %v781_v55, %v782_v21 }
 0x1a8   :  { %v1419_v42 = vpop.eup %1418 }
 0x1a9   :  { %v794_v8 = vrot.slane %v793_v4, 2  ;;  %v799_v35 = vrot.slane %v798_v5, 4  ;;  %v728_v9 = vadd.f32 %v1419_v42, %v1716_v46  ;;  %v789_v10 = vrot.slane %v788_v2, 1  ;;  %v1421_v12 = vpop.eup %1420 }
 0x1aa   :  { %v853_v13 = vsel %vm852_vm2, %v783_v6, %v851_v1  ;;  %v727_v16 = vadd.f32 %v1421_v12, %v1719_v48 }
 0x1ab   :  { %v800_v15 = vmax.f32 %v798_v5, %v799_v35  ;;  %v790_v17 = vmax.f32 %v788_v2, %v789_v10  ;;  %v795_v18 = vmax.f32 %v793_v4, %v794_v8 }
 0x1ac   :  { %v1423_v20 = vpop.eup %1422  ;;  %v805_v22 = vmax.f32 %v727_v16, %v728_v9 }
 0x1ad   :  { %v730_v23 = vadd.f32 %v1423_v20, %v1716_v46  ;;  %v796_v59 = vrot.slane %v795_v18, 1  ;;  %v801_v51 = vrot.slane %v800_v15, 2  ;;  %v855_v26 = vsel %vm854_vm3, %v790_v17, %v853_v13 }
 0x1ae   :  { %v1425_v24 = vpop.eup %1424  ;;  %v806_v27 = vrot.slane %v805_v22, 4 }
 0x1af   :  { %v729_v30 = vadd.f32 %v1425_v24, %v1719_v48  ;;  %v797_v31 = vmax.f32 %v795_v18, %v796_v59  ;;  %v802_v32 = vmax.f32 %v800_v15, %v801_v51 }
 0x1b0   :  { %v807_v36 = vmax.f32 %v805_v22, %v806_v27 }
 0x1b1   :  { %v812_v33 = vmax.f32 %v729_v30, %v730_v23  ;;  %v803_v34 = vrot.slane %v802_v32, 1  ;;  %v857_v37 = vsel %vm856_vm4, %v797_v31, %v855_v26 }
 0x1b2   :  { %v808_v50 = vrot.slane %v807_v36, 2 }
 0x1b3   :  { %v804_v38 = vmax.f32 %v802_v32, %v803_v34  ;;  %v813_v39 = vrot.slane %v812_v33, 4 }
 0x1b4   :  { %v809_v43 = vmax.f32 %v807_v36, %v808_v50 }
 0x1b5   :  { %v814_v46 = vmax.f32 %v812_v33, %v813_v39  ;;  %v859_v3 = vsel %vm858_vm5, %v804_v38, %v857_v37 }
 0x1b6   :  { %v810_v11 = vrot.slane %v809_v43, 1 }
 0x1b7   :  { %v815_v40 = vrot.slane %v814_v46, 2 }
 0x1b8   :  { %v811_v41 = vmax.f32 %v809_v43, %v810_v11 }
 0x1b9   :  { %v816_v44 = vmax.f32 %v814_v46, %v815_v40 }
 0x1ba   :  { %v861_v48 = vsel %vm860_vm6, %v811_v41, %v859_v3 }
 0x1bb   :  { %v817_v0 = vrot.slane %v816_v44, 1 }
 0x1bd   :  { %v818_v45 = vmax.f32 %v816_v44, %v817_v0 }
 0x1bf   :  { %v863_v57 = vsel %vm862_vm7, %v818_v45, %v861_v48 }
 0x1c0   :  { %1262 = vmatmul.mubr.f32.vlgmr.msra.gmra.mrb[32].mxu1 %v863_v57 }
 0x293   :  { %v931_v14 = vpop.f32.mrb[32].mxu1 }
 0x294   :  { %v932_v49 = vadd.f32 %v963_v47, %v931_v14  ;;  %v1263_v52 = vpop.f32.mrb[33].mxu1 }
 0x296   :  { %935 = vmax.xlane.f32.xlu0 %v932_v49 }
 0x323   :  { %v936_v7 = vpop.xlane.xlu0 %935 }
 0x324   :  { %v937_v53 = vsub.f32 %v932_v49, %v936_v7 }
 0x326   :  { %v938_v29 = vmul.f32 1.442695, %v937_v53 }
 0x328   :  { %1426 = vpow2.f32 %v938_v29 }
 0x332   :  { %v1427_v19 = vpop.eup %1426 }
 0x333   :  { %940 = vadd.xlane.f32.xlu0 %v1427_v19 }
 0x3c0   :  { %v941_v54 = vpop.xlane.xlu0 %940 }
 0x3c1   :  { %1428 = vrcp.f32 %v941_v54 }
 0x3cb   :  { %v1429_v55 = vpop.eup %1428 }
 0x3cc   :  { %v943_v56 = vmul.f32 %v1429_v55, %v1427_v19 }
 0x3ce   :  { %944 = vst [vmem:[#allocation11] sm:$0xff] %v943_v56 }
 0x3cf   :  { %1529 = shalt.err (!%p1526_p8)
}
 0x3d0   :  { %s1530_s26 = scalar_lea.hbm %s1777_s6, 128 }
 0x3d1   :  { %p1531_p9 = scmp.ne.s32.totalorder %s1777_s6, %s1530_s26  ;;  %p1534_p10 = scmp.lt.u32.totalorder %s1530_s26, %s1777_s6 }
 0x3d3   :  { %p1536_p11 = pnand %p1534_p10, %p1531_p9 }
 0x3d5   :  { %1539 = shalt.err (!%p1536_p11)
}
 0x3d6   :  { %954 = dma.vmem_to_hbm [thread:$0]  %s952_s22, 128, %s1777_s6, [#allocation5]  }
 0x3d7   :  { %1546 = dma.done.wait [#allocation5], 128  }
 0x3d8   :  { %1547 = vsyncadd [#allocation5], 4294967168 }
 0x3d9   :  { %958 = vsyncpa [#allocation4], 1 }
 0x3da   :  { %959 = vsyncpa [#allocation7], 1 }
 0x3db   :  { %960 = vsyncpa [#allocation10], 1 }
 0x3dc   :  { %961 = vsyncpa [#allocation5], 1 }

</bundles_post_ra>
